<compile_context>
chip_gen: v7x
topology: tpu7x:2x2x1
jax: 0.10.0
libtpu: 0.0.40
codegen_flags: <defaults>
</compile_context>

<pallas_src>
import functools
import math

import jax
import jax.numpy as jnp
from jax import lax
from jax.experimental import pallas as pl
from jax.experimental.pallas import tpu as pltpu

_LN_EPS = 1e-5


def _core_diffusion_kernel(adj_ref, x_ref, w_in_ref, b_in_ref, w_hh_ref,
                           b_hn_ref, gamma_ref, beta_ref, out_ref):
    # Block shapes (all f32):
    #   adj_ref  : (Bg, C*N, N)   adj for this batch group, cores stacked on rows
    #   x_ref    : (Bg, N, D)
    #   w_in_ref : (D, 3H)        columns [W_ir | W_iz | W_in]
    #   b_in_ref : (1, 3H)        [b_ir+b_hr | b_iz+b_hz | b_in]
    #   w_hh_ref : (H, 4H)        columns [W_hr | W_hz | W_hn | 0]  (lane-dense)
    #   b_hn_ref : (1, 4H)        [0 | 0 | b_hn | 0]
    #   gamma_ref, beta_ref : (1, H)
    #   out_ref  : (Bg, N, H)
    Bg = adj_ref.shape[0]
    N = x_ref.shape[1]
    D = x_ref.shape[2]
    C = adj_ref.shape[1] // N
    H = out_ref.shape[2]
    rows = Bg * N                       # batches packed along sublanes

    # ---------------- Hoisted work (off the serial recurrence path) --------
    # (1) Cumulative graph diffusion: one stacked MXU call per packed batch,
    #     then a VPU running sum + relu.
    xt = []                             # xt[bg][c] : (N, D) f32
    for bg in range(Bg):
        res_all = jnp.dot(adj_ref[bg], x_ref[bg],
                          preferred_element_type=jnp.float32)    # (C*N, D)
        acc = jnp.zeros((N, D), jnp.float32)
        steps = []
        for c in range(C):
            acc = acc + res_all[c * N:(c + 1) * N, :]
            steps.append(jnp.maximum(acc, 0.0))                  # relu
        xt.append(steps)

    # (2) Input-side GRU projection for ALL steps / packed batches in one MXU
    #     call.  Row order: step-major, batch-minor (matches h's row packing).
    xt_all = jnp.concatenate(
        [xt[bg][c] for c in range(C) for bg in range(Bg)], axis=0)  # (C*rows, D)
    gi_all = jnp.dot(xt_all, w_in_ref[...],
                     preferred_element_type=jnp.float32) + b_in_ref[...]
    gi_rz = [gi_all[c * rows:(c + 1) * rows, :2 * H] for c in range(C)]
    gi_n = [gi_all[c * rows:(c + 1) * rows, 2 * H:3 * H] for c in range(C)]

    w_hh = w_hh_ref[...]                                          # (H, 4H)
    b_hn = jnp.broadcast_to(b_hn_ref[...], (rows, 4 * H))         # hoisted bcast

    # ------------- Serial GRU recurrence: only h @ W_hh + gate math --------
    # Static unroll; C is small.
    # TODO(synk): if C scales up, cap the unroll and stage gi_all in a VMEM
    #   scratch buffer indexed with pl.ds inside a lax.fori_loop instead of
    #   carrying C vreg-resident slices.
    h = jnp.zeros((rows, H), jnp.float32)
    s = jnp.zeros((rows, H), jnp.float32)
    for c in range(C):
        gh = jnp.dot(h, w_hh, preferred_element_type=jnp.float32) + b_hn
        # r and z in one EUP sigmoid pass; lanes [0, 2H) of gh -> no rotate.
        rz = jax.nn.sigmoid(gi_rz[c] + gh[:, :2 * H])
        r = rz[:, :H]
        z = rz[:, H:2 * H]
        n = jnp.tanh(gi_n[c] + r * gh[:, 2 * H:3 * H])
        h = n + z * (h - n)                                       # == (1-z)*n + z*h
        s = s + h

    # ------------- LayerNorm over the feature dim of the sequence sum ------
    mean = jnp.mean(s, axis=-1, keepdims=True)
    var = jnp.mean(jnp.square(s - mean), axis=-1, keepdims=True)
    out2 = (s - mean) * lax.rsqrt(var + _LN_EPS) * gamma_ref[...] + beta_ref[...]
    for bg in range(Bg):
        out_ref[bg] = out2[bg * N:(bg + 1) * N, :].astype(out_ref.dtype)


def _num_tensorcores() -> int:
    """Best-effort TensorCore count (v7x -> 2); defaults to 1 (v5e/v6e)."""
    try:
        dev = jax.devices()[0]
        for attr in ("num_cores", "num_cores_per_chip", "core_count"):
            n = getattr(dev, attr, None)
            if n:
                return int(n)
    except Exception:
        pass
    return 1


@functools.partial(jax.jit, static_argnames=("num_groups",))
def core_diffusion(x, adj, w_ih, w_hh, b_ih, b_hh, gamma, beta,
                   num_groups=None):
    """CoreDiffusion forward.

    x     : [B, N, D] f32      adj : [B, C, N, N] f32
    w_ih  : [3H, D] f32  (PyTorch GRU layout, gate order r, z, n)
    w_hh  : [3H, H] f32        b_ih, b_hh : [3H] f32
    gamma, beta : [H] f32      (LayerNorm affine)
    returns [B, N, H] f32
    """
    B, N, D = x.shape
    C = adj.shape[1]
    H = w_hh.shape[1]
    f32 = jnp.float32

    # Grid split: one group per TensorCore ("parallel" shards groups across
    # v7x's 2 cores); on single-TC chips all batches fold into one grid step.
    if num_groups is None:
        num_groups = _num_tensorcores()
    G = max(1, min(int(num_groups), B))
    if B % G != 0:
        G = 1
    Bg = B // G

    # Weight / bias assembly (pure layout; fused with the pallas_call under
    # jit — for repeated calls these should be precomputed once).
    w_in = w_ih.T.astype(f32)                                        # (D, 3H)
    b_in = jnp.concatenate([b_ih[:2 * H] + b_hh[:2 * H],
                            b_ih[2 * H:3 * H]]).reshape(1, 3 * H).astype(f32)
    w_hh_p = jnp.concatenate([w_hh.T.astype(f32),
                              jnp.zeros((H, H), f32)], axis=1)       # (H, 4H)
    b_hn = jnp.zeros((1, 4 * H), f32).at[0, 2 * H:3 * H].set(
        b_hh[2 * H:3 * H].astype(f32))
    gamma2 = gamma.reshape(1, H).astype(f32)
    beta2 = beta.reshape(1, H).astype(f32)

    # Stack the core axis onto the node rows (free, contiguous reshape) so the
    # kernel gets the (C*N, N) diffusion operand directly.
    adj2 = adj.reshape(B, C * N, N).astype(f32)
    x2 = x.astype(f32)

    grid_spec = pltpu.PrefetchScalarGridSpec(
        num_scalar_prefetch=0,
        grid=(G,),
        in_specs=[
            pl.BlockSpec((Bg, C * N, N), lambda g: (g, 0, 0)),   # adj group
            pl.BlockSpec((Bg, N, D), lambda g: (g, 0, 0)),       # x group
            pl.BlockSpec((D, 3 * H), lambda g: (0, 0)),          # W_in
            pl.BlockSpec((1, 3 * H), lambda g: (0, 0)),          # b_in
            pl.BlockSpec((H, 4 * H), lambda g: (0, 0)),          # W_hh (padded)
            pl.BlockSpec((1, 4 * H), lambda g: (0, 0)),          # b_hn
            pl.BlockSpec((1, H), lambda g: (0, 0)),              # gamma
            pl.BlockSpec((1, H), lambda g: (0, 0)),              # beta
        ],
        out_specs=pl.BlockSpec((Bg, N, H), lambda g: (g, 0, 0)),
    )

    return pl.pallas_call(
        _core_diffusion_kernel,
        out_shape=jax.ShapeDtypeStruct((B, N, H), f32),
        grid_spec=grid_spec,
        compiler_params=pltpu.CompilerParams(
            dimension_semantics=("parallel",)),
    )(adj2, x2, w_in, b_in, w_hh_p, b_hn, gamma2, beta2)


def reference_forward(x, adj, w_ih, w_hh, b_ih, b_hh, gamma, beta,
                      eps=_LN_EPS):
    """Pure-JAX f32 reference mirroring the PyTorch forward."""
    B, C, N, _ = adj.shape
    D = x.shape[-1]
    H = w_hh.shape[1]
    hp = lax.Precision.HIGHEST
    outs = []
    for b in range(B):
        res = jnp.zeros((N, D), jnp.float32)
        h = jnp.zeros((N, H), jnp.float32)
        s = jnp.zeros((N, H), jnp.float32)
        for c in range(C):
            res = res + jnp.dot(adj[b, c], x[b], precision=hp)
            xt = jnp.maximum(res, 0.0)
            gi = jnp.dot(xt, w_ih.T, precision=hp) + b_ih
            gh = jnp.dot(h, w_hh.T, precision=hp) + b_hh
            r = jax.nn.sigmoid(gi[:, :H] + gh[:, :H])
            z = jax.nn.sigmoid(gi[:, H:2 * H] + gh[:, H:2 * H])
            n = jnp.tanh(gi[:, 2 * H:] + r * gh[:, 2 * H:])
            h = (1.0 - z) * n + z * h
            s = s + h
        mean = s.mean(-1, keepdims=True)
        var = ((s - mean) ** 2).mean(-1, keepdims=True)
        outs.append((s - mean) * lax.rsqrt(var + eps) * gamma + beta)
    return jnp.stack(outs)


if __name__ == "__main__":
    # Small shapes: B=2 graphs, C=4 cores (GRU sequence length), N=8 nodes,
    # input_dim D=16, output_dim H=32.
    B, C, N, D, H = 2, 4, 8, 16, 32

    key = jax.random.PRNGKey(0)
    kx, kadj, k1, k2, k3, k4 = jax.random.split(key, 6)

    x = jax.random.normal(kx, (B, N, D), jnp.float32)
    adj = jax.random.uniform(kadj, (B, C, N, N), jnp.float32)

    # GRU parameters (PyTorch layout [3H, D]/[3H, H], gate order r, z, n).
    scale = 1.0 / math.sqrt(H)
    w_ih = jax.random.uniform(k1, (3 * H, D), jnp.float32, -scale, scale)
    w_hh = jax.random.uniform(k2, (3 * H, H), jnp.float32, -scale, scale)
    b_ih = jax.random.uniform(k3, (3 * H,), jnp.float32, -scale, scale)
    b_hh = jax.random.uniform(k4, (3 * H,), jnp.float32, -scale, scale)

    # LayerNorm parameters (PyTorch default init).
    gamma = jnp.ones((H,), jnp.float32)
    beta = jnp.zeros((H,), jnp.float32)

    out = core_diffusion(x, adj, w_ih, w_hh, b_ih, b_hh, gamma, beta)
    out = jax.block_until_ready(out)
    assert out.shape == (B, N, H), out.shape

    ref = reference_forward(x, adj, w_ih, w_hh, b_ih, b_hh, gamma, beta)
    err = float(jnp.abs(out - ref).max())
    assert jnp.allclose(out, ref, atol=2e-2, rtol=2e-2), err

    print("KERNEL_OK")
</pallas_src>

<mosaic_0001>
module attributes {stable_mosaic.version = 11 : i64} {
  func.func @_core_diffusion_kernel(%arg0: i32, %arg1: memref<2x32x8xf32, #tpu.memory_space<vmem>>, %arg2: memref<2x8x16xf32, #tpu.memory_space<vmem>>, %arg3: memref<16x96xf32, #tpu.memory_space<vmem>>, %arg4: memref<1x96xf32, #tpu.memory_space<vmem>>, %arg5: memref<32x128xf32, #tpu.memory_space<vmem>>, %arg6: memref<1x128xf32, #tpu.memory_space<vmem>>, %arg7: memref<1x32xf32, #tpu.memory_space<vmem>>, %arg8: memref<1x32xf32, #tpu.memory_space<vmem>>, %arg9: memref<2x8x32xf32, #tpu.memory_space<vmem>>) attributes {dimension_semantics = [#tpu.dimension_semantics<parallel>], iteration_bounds = array<i64: 1>, scalar_prefetch = 0 : i64, scratch_operands = 0 : i64, tpu.core_type = #tpu.core_type<tc>, window_params = [{transform_indices = @transform_0, window_bounds = array<i64: 2, 32, 8>}, {transform_indices = @transform_1, window_bounds = array<i64: 2, 8, 16>}, {pipeline_mode = #tpu.pipeline_mode<synchronous>, transform_indices = @transform_2, window_bounds = array<i64: 16, 96>}, {pipeline_mode = #tpu.pipeline_mode<synchronous>, transform_indices = @transform_3, window_bounds = array<i64: 1, 96>}, {pipeline_mode = #tpu.pipeline_mode<synchronous>, transform_indices = @transform_4, window_bounds = array<i64: 32, 128>}, {pipeline_mode = #tpu.pipeline_mode<synchronous>, transform_indices = @transform_5, window_bounds = array<i64: 1, 128>}, {pipeline_mode = #tpu.pipeline_mode<synchronous>, transform_indices = @transform_6, window_bounds = array<i64: 1, 32>}, {pipeline_mode = #tpu.pipeline_mode<synchronous>, transform_indices = @transform_7, window_bounds = array<i64: 1, 32>}, {transform_indices = @transform_8, window_bounds = array<i64: 2, 8, 32>}]} {
    %c0 = arith.constant 0 : index
    %c0_0 = arith.constant 0 : index
    %c0_1 = arith.constant 0 : index
    %0 = vector.load %arg1[%c0, %c0_0, %c0_1] : memref<2x32x8xf32, #tpu.memory_space<vmem>>, vector<1x32x8xf32>
    %1 = vector.shape_cast %0 : vector<1x32x8xf32> to vector<32x8xf32>
    %c0_2 = arith.constant 0 : index
    %c0_3 = arith.constant 0 : index
    %c0_4 = arith.constant 0 : index
    %2 = vector.load %arg2[%c0_2, %c0_3, %c0_4] : memref<2x8x16xf32, #tpu.memory_space<vmem>>, vector<1x8x16xf32>
    %3 = vector.shape_cast %2 : vector<1x8x16xf32> to vector<8x16xf32>
    %cst = arith.constant dense<0.000000e+00> : vector<32x16xf32>
    %4 = tpu.matmul %1, %3, %cst {dimension_numbers = #tpu.dot_dimension_numbers<[1], [0], [0], [1], [0, 0, 1, 1], [], []>} : vector<32x8xf32>, vector<8x16xf32>, vector<32x16xf32> -> vector<32x16xf32>
    %cst_5 = arith.constant 0.000000e+00 : f32
    %5 = vector.broadcast %cst_5 : f32 to vector<8x16xf32>
    %6 = vector.extract_strided_slice %4 {offsets = [0, 0], sizes = [8, 16], strides = [1, 1]} : vector<32x16xf32> to vector<8x16xf32>
    %7 = arith.addf %5, %6 : vector<8x16xf32>
    %cst_6 = arith.constant 0.000000e+00 : f32
    %8 = vector.broadcast %cst_6 : f32 to vector<8x16xf32>
    %9 = arith.maximumf %7, %8 : vector<8x16xf32>
    %10 = vector.extract_strided_slice %4 {offsets = [8, 0], sizes = [8, 16], strides = [1, 1]} : vector<32x16xf32> to vector<8x16xf32>
    %11 = arith.addf %7, %10 : vector<8x16xf32>
    %cst_7 = arith.constant 0.000000e+00 : f32
    %12 = vector.broadcast %cst_7 : f32 to vector<8x16xf32>
    %13 = arith.maximumf %11, %12 : vector<8x16xf32>
    %14 = vector.extract_strided_slice %4 {offsets = [16, 0], sizes = [8, 16], strides = [1, 1]} : vector<32x16xf32> to vector<8x16xf32>
    %15 = arith.addf %11, %14 : vector<8x16xf32>
    %cst_8 = arith.constant 0.000000e+00 : f32
    %16 = vector.broadcast %cst_8 : f32 to vector<8x16xf32>
    %17 = arith.maximumf %15, %16 : vector<8x16xf32>
    %18 = vector.extract_strided_slice %4 {offsets = [24, 0], sizes = [8, 16], strides = [1, 1]} : vector<32x16xf32> to vector<8x16xf32>
    %19 = arith.addf %15, %18 : vector<8x16xf32>
    %cst_9 = arith.constant 0.000000e+00 : f32
    %20 = vector.broadcast %cst_9 : f32 to vector<8x16xf32>
    %21 = arith.maximumf %19, %20 : vector<8x16xf32>
    %c1 = arith.constant 1 : index
    %c0_10 = arith.constant 0 : index
    %c0_11 = arith.constant 0 : index
    %22 = vector.load %arg1[%c1, %c0_10, %c0_11] : memref<2x32x8xf32, #tpu.memory_space<vmem>>, vector<1x32x8xf32>
    %23 = vector.shape_cast %22 : vector<1x32x8xf32> to vector<32x8xf32>
    %c1_12 = arith.constant 1 : index
    %c0_13 = arith.constant 0 : index
    %c0_14 = arith.constant 0 : index
    %24 = vector.load %arg2[%c1_12, %c0_13, %c0_14] : memref<2x8x16xf32, #tpu.memory_space<vmem>>, vector<1x8x16xf32>
    %25 = vector.shape_cast %24 : vector<1x8x16xf32> to vector<8x16xf32>
    %cst_15 = arith.constant dense<0.000000e+00> : vector<32x16xf32>
    %26 = tpu.matmul %23, %25, %cst_15 {dimension_numbers = #tpu.dot_dimension_numbers<[1], [0], [0], [1], [0, 0, 1, 1], [], []>} : vector<32x8xf32>, vector<8x16xf32>, vector<32x16xf32> -> vector<32x16xf32>
    %cst_16 = arith.constant 0.000000e+00 : f32
    %27 = vector.broadcast %cst_16 : f32 to vector<8x16xf32>
    %28 = vector.extract_strided_slice %26 {offsets = [0, 0], sizes = [8, 16], strides = [1, 1]} : vector<32x16xf32> to vector<8x16xf32>
    %29 = arith.addf %27, %28 : vector<8x16xf32>
    %cst_17 = arith.constant 0.000000e+00 : f32
    %30 = vector.broadcast %cst_17 : f32 to vector<8x16xf32>
    %31 = arith.maximumf %29, %30 : vector<8x16xf32>
    %32 = vector.extract_strided_slice %26 {offsets = [8, 0], sizes = [8, 16], strides = [1, 1]} : vector<32x16xf32> to vector<8x16xf32>
    %33 = arith.addf %29, %32 : vector<8x16xf32>
    %cst_18 = arith.constant 0.000000e+00 : f32
    %34 = vector.broadcast %cst_18 : f32 to vector<8x16xf32>
    %35 = arith.maximumf %33, %34 : vector<8x16xf32>
    %36 = vector.extract_strided_slice %26 {offsets = [16, 0], sizes = [8, 16], strides = [1, 1]} : vector<32x16xf32> to vector<8x16xf32>
    %37 = arith.addf %33, %36 : vector<8x16xf32>
    %cst_19 = arith.constant 0.000000e+00 : f32
    %38 = vector.broadcast %cst_19 : f32 to vector<8x16xf32>
    %39 = arith.maximumf %37, %38 : vector<8x16xf32>
    %40 = vector.extract_strided_slice %26 {offsets = [24, 0], sizes = [8, 16], strides = [1, 1]} : vector<32x16xf32> to vector<8x16xf32>
    %41 = arith.addf %37, %40 : vector<8x16xf32>
    %cst_20 = arith.constant 0.000000e+00 : f32
    %42 = vector.broadcast %cst_20 : f32 to vector<8x16xf32>
    %43 = arith.maximumf %41, %42 : vector<8x16xf32>
    %44 = tpu.concatenate %9, %31, %13, %35, %17, %39, %21, %43 in 0 : vector<8x16xf32>, vector<8x16xf32>, vector<8x16xf32>, vector<8x16xf32>, vector<8x16xf32>, vector<8x16xf32>, vector<8x16xf32>, vector<8x16xf32> -> vector<64x16xf32>
    %c0_21 = arith.constant 0 : index
    %c0_22 = arith.constant 0 : index
    %45 = vector.load %arg3[%c0_21, %c0_22] : memref<16x96xf32, #tpu.memory_space<vmem>>, vector<16x96xf32>
    %cst_23 = arith.constant dense<0.000000e+00> : vector<64x96xf32>
    %46 = tpu.matmul %44, %45, %cst_23 {dimension_numbers = #tpu.dot_dimension_numbers<[1], [0], [0], [1], [0, 0, 1, 1], [], []>} : vector<64x16xf32>, vector<16x96xf32>, vector<64x96xf32> -> vector<64x96xf32>
    %c0_24 = arith.constant 0 : index
    %c0_25 = arith.constant 0 : index
    %47 = vector.load %arg4[%c0_24, %c0_25] : memref<1x96xf32, #tpu.memory_space<vmem>>, vector<1x96xf32>
    %48 = vector.broadcast %47 : vector<1x96xf32> to vector<64x96xf32>
    %49 = arith.addf %46, %48 : vector<64x96xf32>
    %50 = vector.extract_strided_slice %49 {offsets = [0, 0], sizes = [16, 64], strides = [1, 1]} : vector<64x96xf32> to vector<16x64xf32>
    %51 = vector.extract_strided_slice %49 {offsets = [16, 0], sizes = [16, 64], strides = [1, 1]} : vector<64x96xf32> to vector<16x64xf32>
    %52 = vector.extract_strided_slice %49 {offsets = [32, 0], sizes = [16, 64], strides = [1, 1]} : vector<64x96xf32> to vector<16x64xf32>
    %53 = vector.extract_strided_slice %49 {offsets = [48, 0], sizes = [16, 64], strides = [1, 1]} : vector<64x96xf32> to vector<16x64xf32>
    %54 = vector.extract_strided_slice %49 {offsets = [0, 64], sizes = [16, 32], strides = [1, 1]} : vector<64x96xf32> to vector<16x32xf32>
    %55 = vector.extract_strided_slice %49 {offsets = [16, 64], sizes = [16, 32], strides = [1, 1]} : vector<64x96xf32> to vector<16x32xf32>
    %56 = vector.extract_strided_slice %49 {offsets = [32, 64], sizes = [16, 32], strides = [1, 1]} : vector<64x96xf32> to vector<16x32xf32>
    %57 = vector.extract_strided_slice %49 {offsets = [48, 64], sizes = [16, 32], strides = [1, 1]} : vector<64x96xf32> to vector<16x32xf32>
    %c0_26 = arith.constant 0 : index
    %c0_27 = arith.constant 0 : index
    %58 = vector.load %arg5[%c0_26, %c0_27] : memref<32x128xf32, #tpu.memory_space<vmem>>, vector<32x128xf32>
    %c0_28 = arith.constant 0 : index
    %c0_29 = arith.constant 0 : index
    %59 = vector.load %arg6[%c0_28, %c0_29] : memref<1x128xf32, #tpu.memory_space<vmem>>, vector<1x128xf32>
    %60 = vector.shape_cast %59 : vector<1x128xf32> to vector<1x128xf32>
    %61 = vector.broadcast %60 : vector<1x128xf32> to vector<16x128xf32>
    %cst_30 = arith.constant 0.000000e+00 : f32
    %62 = vector.broadcast %cst_30 : f32 to vector<16x32xf32>
    %cst_31 = arith.constant 0.000000e+00 : f32
    %63 = vector.broadcast %cst_31 : f32 to vector<16x32xf32>
    %cst_32 = arith.constant dense<0.000000e+00> : vector<16x128xf32>
    %64 = tpu.matmul %62, %58, %cst_32 {dimension_numbers = #tpu.dot_dimension_numbers<[1], [0], [0], [1], [0, 0, 1, 1], [], []>} : vector<16x32xf32>, vector<32x128xf32>, vector<16x128xf32> -> vector<16x128xf32>
    %65 = arith.addf %64, %61 : vector<16x128xf32>
    %66 = vector.extract_strided_slice %65 {offsets = [0, 0], sizes = [16, 64], strides = [1, 1]} : vector<16x128xf32> to vector<16x64xf32>
    %67 = arith.addf %50, %66 : vector<16x64xf32>
    %68 = arith.negf %67 : vector<16x64xf32>
    %69 = math.exp %68 : vector<16x64xf32>
    %cst_33 = arith.constant 1.000000e+00 : f32
    %70 = vector.broadcast %cst_33 : f32 to vector<16x64xf32>
    %71 = arith.addf %70, %69 : vector<16x64xf32>
    %72 = arith.divf %70, %71 : vector<16x64xf32>
    %73 = vector.extract_strided_slice %72 {offsets = [0, 0], sizes = [16, 32], strides = [1, 1]} : vector<16x64xf32> to vector<16x32xf32>
    %74 = vector.extract_strided_slice %72 {offsets = [0, 32], sizes = [16, 32], strides = [1, 1]} : vector<16x64xf32> to vector<16x32xf32>
    %75 = vector.extract_strided_slice %65 {offsets = [0, 64], sizes = [16, 32], strides = [1, 1]} : vector<16x128xf32> to vector<16x32xf32>
    %76 = arith.mulf %73, %75 : vector<16x32xf32>
    %77 = arith.addf %54, %76 : vector<16x32xf32>
    %78 = math.tanh %77 : vector<16x32xf32>
    %79 = arith.subf %62, %78 : vector<16x32xf32>
    %80 = arith.mulf %74, %79 : vector<16x32xf32>
    %81 = arith.addf %78, %80 : vector<16x32xf32>
    %82 = arith.addf %63, %81 : vector<16x32xf32>
    %cst_34 = arith.constant dense<0.000000e+00> : vector<16x128xf32>
    %83 = tpu.matmul %81, %58, %cst_34 {dimension_numbers = #tpu.dot_dimension_numbers<[1], [0], [0], [1], [0, 0, 1, 1], [], []>} : vector<16x32xf32>, vector<32x128xf32>, vector<16x128xf32> -> vector<16x128xf32>
    %84 = arith.addf %83, %61 : vector<16x128xf32>
    %85 = vector.extract_strided_slice %84 {offsets = [0, 0], sizes = [16, 64], strides = [1, 1]} : vector<16x128xf32> to vector<16x64xf32>
    %86 = arith.addf %51, %85 : vector<16x64xf32>
    %87 = arith.negf %86 : vector<16x64xf32>
    %88 = math.exp %87 : vector<16x64xf32>
    %cst_35 = arith.constant 1.000000e+00 : f32
    %89 = vector.broadcast %cst_35 : f32 to vector<16x64xf32>
    %90 = arith.addf %89, %88 : vector<16x64xf32>
    %91 = arith.divf %89, %90 : vector<16x64xf32>
    %92 = vector.extract_strided_slice %91 {offsets = [0, 0], sizes = [16, 32], strides = [1, 1]} : vector<16x64xf32> to vector<16x32xf32>
    %93 = vector.extract_strided_slice %91 {offsets = [0, 32], sizes = [16, 32], strides = [1, 1]} : vector<16x64xf32> to vector<16x32xf32>
    %94 = vector.extract_strided_slice %84 {offsets = [0, 64], sizes = [16, 32], strides = [1, 1]} : vector<16x128xf32> to vector<16x32xf32>
    %95 = arith.mulf %92, %94 : vector<16x32xf32>
    %96 = arith.addf %55, %95 : vector<16x32xf32>
    %97 = math.tanh %96 : vector<16x32xf32>
    %98 = arith.subf %81, %97 : vector<16x32xf32>
    %99 = arith.mulf %93, %98 : vector<16x32xf32>
    %100 = arith.addf %97, %99 : vector<16x32xf32>
    %101 = arith.addf %82, %100 : vector<16x32xf32>
    %cst_36 = arith.constant dense<0.000000e+00> : vector<16x128xf32>
    %102 = tpu.matmul %100, %58, %cst_36 {dimension_numbers = #tpu.dot_dimension_numbers<[1], [0], [0], [1], [0, 0, 1, 1], [], []>} : vector<16x32xf32>, vector<32x128xf32>, vector<16x128xf32> -> vector<16x128xf32>
    %103 = arith.addf %102, %61 : vector<16x128xf32>
    %104 = vector.extract_strided_slice %103 {offsets = [0, 0], sizes = [16, 64], strides = [1, 1]} : vector<16x128xf32> to vector<16x64xf32>
    %105 = arith.addf %52, %104 : vector<16x64xf32>
    %106 = arith.negf %105 : vector<16x64xf32>
    %107 = math.exp %106 : vector<16x64xf32>
    %cst_37 = arith.constant 1.000000e+00 : f32
    %108 = vector.broadcast %cst_37 : f32 to vector<16x64xf32>
    %109 = arith.addf %108, %107 : vector<16x64xf32>
    %110 = arith.divf %108, %109 : vector<16x64xf32>
    %111 = vector.extract_strided_slice %110 {offsets = [0, 0], sizes = [16, 32], strides = [1, 1]} : vector<16x64xf32> to vector<16x32xf32>
    %112 = vector.extract_strided_slice %110 {offsets = [0, 32], sizes = [16, 32], strides = [1, 1]} : vector<16x64xf32> to vector<16x32xf32>
    %113 = vector.extract_strided_slice %103 {offsets = [0, 64], sizes = [16, 32], strides = [1, 1]} : vector<16x128xf32> to vector<16x32xf32>
    %114 = arith.mulf %111, %113 : vector<16x32xf32>
    %115 = arith.addf %56, %114 : vector<16x32xf32>
    %116 = math.tanh %115 : vector<16x32xf32>
    %117 = arith.subf %100, %116 : vector<16x32xf32>
    %118 = arith.mulf %112, %117 : vector<16x32xf32>
    %119 = arith.addf %116, %118 : vector<16x32xf32>
    %120 = arith.addf %101, %119 : vector<16x32xf32>
    %cst_38 = arith.constant dense<0.000000e+00> : vector<16x128xf32>
    %121 = tpu.matmul %119, %58, %cst_38 {dimension_numbers = #tpu.dot_dimension_numbers<[1], [0], [0], [1], [0, 0, 1, 1], [], []>} : vector<16x32xf32>, vector<32x128xf32>, vector<16x128xf32> -> vector<16x128xf32>
    %122 = arith.addf %121, %61 : vector<16x128xf32>
    %123 = vector.extract_strided_slice %122 {offsets = [0, 0], sizes = [16, 64], strides = [1, 1]} : vector<16x128xf32> to vector<16x64xf32>
    %124 = arith.addf %53, %123 : vector<16x64xf32>
    %125 = arith.negf %124 : vector<16x64xf32>
    %126 = math.exp %125 : vector<16x64xf32>
    %cst_39 = arith.constant 1.000000e+00 : f32
    %127 = vector.broadcast %cst_39 : f32 to vector<16x64xf32>
    %128 = arith.addf %127, %126 : vector<16x64xf32>
    %129 = arith.divf %127, %128 : vector<16x64xf32>
    %130 = vector.extract_strided_slice %129 {offsets = [0, 0], sizes = [16, 32], strides = [1, 1]} : vector<16x64xf32> to vector<16x32xf32>
    %131 = vector.extract_strided_slice %129 {offsets = [0, 32], sizes = [16, 32], strides = [1, 1]} : vector<16x64xf32> to vector<16x32xf32>
    %132 = vector.extract_strided_slice %122 {offsets = [0, 64], sizes = [16, 32], strides = [1, 1]} : vector<16x128xf32> to vector<16x32xf32>
    %133 = arith.mulf %130, %132 : vector<16x32xf32>
    %134 = arith.addf %57, %133 : vector<16x32xf32>
    %135 = math.tanh %134 : vector<16x32xf32>
    %136 = arith.subf %119, %135 : vector<16x32xf32>
    %137 = arith.mulf %131, %136 : vector<16x32xf32>
    %138 = arith.addf %135, %137 : vector<16x32xf32>
    %139 = arith.addf %120, %138 : vector<16x32xf32>
    %cst_40 = arith.constant dense<0.000000e+00> : vector<16xf32>
    %140 = vector.multi_reduction <add>, %139, %cst_40 [1] : vector<16x32xf32> to vector<16xf32>
    %141 = vector.shape_cast %140 : vector<16xf32> to vector<16x1xf32>
    %cst_41 = arith.constant 3.200000e+01 : f32
    %142 = vector.broadcast %cst_41 : f32 to vector<16x1xf32>
    %143 = arith.divf %141, %142 : vector<16x1xf32>
    %144 = vector.broadcast %143 : vector<16x1xf32> to vector<16x32xf32>
    %145 = arith.subf %139, %144 : vector<16x32xf32>
    %146 = arith.mulf %145, %145 : vector<16x32xf32>
    %cst_42 = arith.constant dense<0.000000e+00> : vector<16xf32>
    %147 = vector.multi_reduction <add>, %146, %cst_42 [1] : vector<16x32xf32> to vector<16xf32>
    %148 = vector.shape_cast %147 : vector<16xf32> to vector<16x1xf32>
    %cst_43 = arith.constant 3.200000e+01 : f32
    %149 = vector.broadcast %cst_43 : f32 to vector<16x1xf32>
    %150 = arith.divf %148, %149 : vector<16x1xf32>
    %151 = vector.broadcast %143 : vector<16x1xf32> to vector<16x32xf32>
    %152 = arith.subf %139, %151 : vector<16x32xf32>
    %cst_44 = arith.constant 9.99999974E-6 : f32
    %153 = vector.broadcast %cst_44 : f32 to vector<16x1xf32>
    %154 = arith.addf %150, %153 : vector<16x1xf32>
    %155 = math.rsqrt %154 : vector<16x1xf32>
    %156 = vector.broadcast %155 : vector<16x1xf32> to vector<16x32xf32>
    %157 = arith.mulf %152, %156 : vector<16x32xf32>
    %c0_45 = arith.constant 0 : index
    %c0_46 = arith.constant 0 : index
    %158 = vector.load %arg7[%c0_45, %c0_46] : memref<1x32xf32, #tpu.memory_space<vmem>>, vector<1x32xf32>
    %159 = vector.broadcast %158 : vector<1x32xf32> to vector<16x32xf32>
    %160 = arith.mulf %157, %159 : vector<16x32xf32>
    %c0_47 = arith.constant 0 : index
    %c0_48 = arith.constant 0 : index
    %161 = vector.load %arg8[%c0_47, %c0_48] : memref<1x32xf32, #tpu.memory_space<vmem>>, vector<1x32xf32>
    %162 = vector.broadcast %161 : vector<1x32xf32> to vector<16x32xf32>
    %163 = arith.addf %160, %162 : vector<16x32xf32>
    %164 = vector.extract_strided_slice %163 {offsets = [0, 0], sizes = [8, 32], strides = [1, 1]} : vector<16x32xf32> to vector<8x32xf32>
    %c0_49 = arith.constant 0 : index
    %c0_50 = arith.constant 0 : index
    %c0_51 = arith.constant 0 : index
    %165 = vector.load %arg9[%c0_49, %c0_50, %c0_51] : memref<2x8x32xf32, #tpu.memory_space<vmem>>, vector<1x8x32xf32>
    %166 = vector.shape_cast %165 : vector<1x8x32xf32> to vector<8x32xf32>
    %167 = vector.shape_cast %164 : vector<8x32xf32> to vector<1x8x32xf32>
    tpu.vector_store %arg9[%c0_49, %c0_50, %c0_51], %167 {strides = array<i32>} : memref<2x8x32xf32, #tpu.memory_space<vmem>>, vector<1x8x32xf32>,
    %168 = vector.extract_strided_slice %163 {offsets = [8, 0], sizes = [8, 32], strides = [1, 1]} : vector<16x32xf32> to vector<8x32xf32>
    %c1_52 = arith.constant 1 : index
    %c0_53 = arith.constant 0 : index
    %c0_54 = arith.constant 0 : index
    %169 = vector.load %arg9[%c1_52, %c0_53, %c0_54] : memref<2x8x32xf32, #tpu.memory_space<vmem>>, vector<1x8x32xf32>
    %170 = vector.shape_cast %169 : vector<1x8x32xf32> to vector<8x32xf32>
    %171 = vector.shape_cast %168 : vector<8x32xf32> to vector<1x8x32xf32>
    tpu.vector_store %arg9[%c1_52, %c0_53, %c0_54], %171 {strides = array<i32>} : memref<2x8x32xf32, #tpu.memory_space<vmem>>, vector<1x8x32xf32>,
    return
  }
  func.func @transform_0(%arg0: i32) -> (i32, i32, i32) {
    %c0_i32 = arith.constant 0 : i32
    %c0_i32_0 = arith.constant 0 : i32
    %c0_i32_1 = arith.constant 0 : i32
    return %arg0, %c0_i32, %c0_i32_0 : i32, i32, i32
  }
  func.func @transform_1(%arg0: i32) -> (i32, i32, i32) {
    %c0_i32 = arith.constant 0 : i32
    %c0_i32_0 = arith.constant 0 : i32
    %c0_i32_1 = arith.constant 0 : i32
    return %arg0, %c0_i32, %c0_i32_0 : i32, i32, i32
  }
  func.func @transform_2(%arg0: i32) -> (i32, i32) {
    %c0_i32 = arith.constant 0 : i32
    %c0_i32_0 = arith.constant 0 : i32
    %c0_i32_1 = arith.constant 0 : i32
    return %c0_i32, %c0_i32_0 : i32, i32
  }
  func.func @transform_3(%arg0: i32) -> (i32, i32) {
    %c0_i32 = arith.constant 0 : i32
    %c0_i32_0 = arith.constant 0 : i32
    %c0_i32_1 = arith.constant 0 : i32
    return %c0_i32, %c0_i32_0 : i32, i32
  }
  func.func @transform_4(%arg0: i32) -> (i32, i32) {
    %c0_i32 = arith.constant 0 : i32
    %c0_i32_0 = arith.constant 0 : i32
    %c0_i32_1 = arith.constant 0 : i32
    return %c0_i32, %c0_i32_0 : i32, i32
  }
  func.func @transform_5(%arg0: i32) -> (i32, i32) {
    %c0_i32 = arith.constant 0 : i32
    %c0_i32_0 = arith.constant 0 : i32
    %c0_i32_1 = arith.constant 0 : i32
    return %c0_i32, %c0_i32_0 : i32, i32
  }
  func.func @transform_6(%arg0: i32) -> (i32, i32) {
    %c0_i32 = arith.constant 0 : i32
    %c0_i32_0 = arith.constant 0 : i32
    %c0_i32_1 = arith.constant 0 : i32
    return %c0_i32, %c0_i32_0 : i32, i32
  }
  func.func @transform_7(%arg0: i32) -> (i32, i32) {
    %c0_i32 = arith.constant 0 : i32
    %c0_i32_0 = arith.constant 0 : i32
    %c0_i32_1 = arith.constant 0 : i32
    return %c0_i32, %c0_i32_0 : i32, i32
  }
  func.func @transform_8(%arg0: i32) -> (i32, i32, i32) {
    %c0_i32 = arith.constant 0 : i32
    %c0_i32_0 = arith.constant 0 : i32
    %c0_i32_1 = arith.constant 0 : i32
    return %arg0, %c0_i32, %c0_i32_0 : i32, i32, i32
  }
}

</mosaic_0001>

<bundles_post_ra>
// kernel: core_diffusion.1
= control target key start
LH: loop header
LB: loop body
LE: loop exit
PB: predicated region body
PF: predicated region fallthrough
CT: control target
= control target key end

     0   :  { %vm35_vm0 = vcmask 64512   ;;  %s1619_s0 = inlined_call_operand.vmem [shape: f32[2,32,8], index: 0, kind: input, shape index: {}]   ;;  %s1620_s1 = inlined_call_operand.vmem [shape: f32[2,8,16], index: 1, kind: input, shape index: {}]   ;;  %s1621_s2 = inlined_call_operand.vmem [shape: f32[16,96], index: 2, kind: input, shape index: {}]   ;;  %s1622_s3 = inlined_call_operand.vmem [shape: f32[1,96], index: 3, kind: input, shape index: {}]   ;;  %s1623_s4 = inlined_call_operand.vmem [shape: f32[32,128], index: 4, kind: input, shape index: {}]   ;;  %s1624_s5 = inlined_call_operand.vmem [shape: f32[1,128], index: 5, kind: input, shape index: {}]   ;;  %s1625_s6 = inlined_call_operand.vmem [shape: f32[1,32], index: 6, kind: input, shape index: {}]   ;;  %s1626_s7 = inlined_call_operand.vmem [shape: f32[1,32], index: 7, kind: input, shape index: {}]   ;;  %s1627_s8 = inlined_call_operand.hbm [shape: f32[2,8,32], index: 8, kind: output, shape index: {}]  }
   0x1   :  { %v34_v0 = vld [vmem:[%s1620_s1] sm:$0xff]  ;;  %v1077_v1 = vld [vmem:[%s1620_s1 + $0x8] sm:$0xff]  ;;  %v32_v6 = vld [vmem:[%s1619_s0 + $0x10] sm:$0xff] }
   0x2   :  { %v30_v2 = vld [vmem:[%s1619_s0] sm:$0xff]  ;;  %1152 = vmatprep.subr.mxu0 %v34_v0  ;;  %1160 = vmatprep.subr.mxu1 %v1077_v1  ;;  %v31_v4 = vld [vmem:[%s1619_s0 + $0x8] sm:$0xff]  ;;  %v1075_v7 = vld [vmem:[%s1619_s0 + $0x30] sm:$0xff] }
   0x3   :  { %v1073_v3 = vld [vmem:[%s1619_s0 + $0x20] sm:$0xff]  ;;  %v1074_v5 = vld [vmem:[%s1619_s0 + $0x28] sm:$0xff]  ;;  %1153 = vmatpush3.msra.mxu0 %v34_v0  ;;  %1154 = vmatprep.mubr.msk.f32.mxu0 %vm35_vm0, %v30_v2  ;;  %v33_v8 = vld [vmem:[%s1619_s0 + $0x18] sm:$0xff] }
   0x4   :  { %1161 = vmatpush3.msra.mxu1 %v1077_v1  ;;  %1162 = vmatprep.mubr.msk.f32.mxu1 %vm35_vm0, %v1073_v3  ;;  %v392_v9 = vld [vmem:[%s1623_s4] sm:$0xff]  ;;  %v393_v10 = vld [vmem:[%s1623_s4 + $0x8] sm:$0xff]  ;;  %v394_v12 = vld [vmem:[%s1623_s4 + $0x10] sm:$0xff] }
   0x5   :  { %1155 = vmatmul.mubr.msk.f32.vlgmr.msra.gmra.mrb[0].mxu0 %vm35_vm0, %v31_v4  ;;  %1163 = vmatmul.mubr.msk.f32.vlgmr.msra.gmra.mrb[0].mxu1 %vm35_vm0, %v1074_v5  ;;  %v1436_v11 = vpack.c.bf16 %v393_v10, %v392_v9  ;;  %v395_v13 = vld [vmem:[%s1623_s4 + $0x18] sm:$0xff]  ;;  %v253_v14 = vld [vmem:[%s1621_s2] sm:$0xff]  ;;  %v254_v17 = vld [vmem:[%s1621_s2 + $0x8] sm:$0xff] }
   0x6   :  { %1157 = vmatprep.mubr.msk.f32.mxu0 %vm35_vm0, %v32_v6  ;;  %1165 = vmatprep.mubr.msk.f32.mxu1 %vm35_vm0, %v1075_v7  ;;  %v1076_v15 = vld [vmem:[%s1619_s0 + $0x38] sm:$0xff]  ;;  %v1452_v16 = vpack.c.bf16 %v395_v13, %v394_v12 }
   0x7   :  { %13 = vsyncpa [#allocation3], 0  ;;  %1233 = vmatprep.subr.bf16.mxu1 %v1436_v11  ;;  %v1228_v18 = vpack.c.bf16 %v254_v17, %v253_v14  ;;  %v1347_v19 = vmov 0.0   ;;  %vm262_vm1 = vcmask 130048   ;;  %v1478_v39 = vld [vmem:[%s1624_s5] ss:$0 sm:$0xff] }
   0x8   :  { %1235 = vmatpush3.bf16.msra.mxu1 %v1436_v11  ;;  %s1348_s4 = smov 64   ;;  %v1082_v47 = vld [vmem:[%s1622_s3] ss:$0 sm:$0xff]  ;;  %s1349_s3 = smov 96   ;;  %vm403_vm2 = vcmask 261120  }
   0x9   :  { %1158 = vmatmul.mubr.msk.f32.gmra.mrb[2].mxu0 %vm35_vm0, %v33_v8  ;;  %1166 = vmatmul.mubr.msk.f32.gmra.mrb[2].mxu1 %vm35_vm0, %v1076_v15  ;;  %s1350_s15 = smov 32  }
   0xa   :  { %1237 = vmatprep.subr.bf16.mxu1 %v1452_v16  ;;  %1192 = vmatprep.mubr.f32.mxu1 %v1347_v19 }
   0xb   :  { %1229 = vmatprep.subr.bf16.mxu0 %v1228_v18 }
   0xc   :  { %1239 = vmatpush3.bf16.msra.mxu1 %v1452_v16  ;;  %1231 = vmatpush3.bf16.msra.mxu0 %v1228_v18 }
   0xd   :  { %1241 = vmatprep.subr.bf16.mxu1 %v1436_v11  ;;  %1249 = vmatprep.subr.bf16.mxu0 %v1436_v11 }
   0xf   :  { %1193 = vmatmul.mubr.f32.vlgmr.msra.gmra.mrb[4].mxu1 %v1347_v19 }
  0x10   :  { %1243 = vmatpush3.bf16.msra.mxu1 %v1436_v11 }
  0x11   :  { %1245 = vmatprep.subr.bf16.mxu1 %v1452_v16 }
  0x14   :  { %1247 = vmatpush3.bf16.msra.mxu1 %v1452_v16 }
  0x15   :  { %1257 = vmatprep.subr.bf16.mxu1 %v1436_v11 }
  0xd8   :  { %v1156_v20 = vpop.f32.mrb[0].mxu0  ;;  %v1164_v21 = vpop.f32.mrb[0].mxu1 }
  0xd9   :  { %v114_v22 = vpop.f32.mrb[1].mxu0  ;;  %v226_v23 = vpop.f32.mrb[1].mxu1 }
  0xda   :  { %v134_v24 = vmax.f32 %v114_v22, 0.0  ;;  %v135_v25 = vadd.f32 %v1156_v20, %v114_v22  ;;  %v246_v26 = vmax.f32 %v226_v23, 0.0  ;;  %v247_v27 = vadd.f32 %v1164_v21, %v226_v23 }
  0xdc   :  { %v136_v28 = vmax.f32 %v135_v25, 0.0  ;;  %v1159_v29 = vpop.f32.mrb[2].mxu0  ;;  %v1167_v30 = vpop.f32.mrb[2].mxu1  ;;  %1172 = vmatprep.mubr.msk.f32.mxu0 %vm262_vm1, %v134_v24  ;;  %v248_v35 = vmax.f32 %v247_v27, 0.0 }
  0xdd   :  { %v124_v31 = vpop.f32.mrb[3].mxu0  ;;  %v236_v32 = vpop.f32.mrb[3].mxu1  ;;  %1173 = vmatmul.mubr.msk.f32.vlgmr.msra.gmra.mrb[4].mxu0 %vm262_vm1, %v246_v26 }
  0xde   :  { %v137_v33 = vadd.f32 %v135_v25, %v124_v31  ;;  %v249_v34 = vadd.f32 %v247_v27, %v236_v32  ;;  %1175 = vmatprep.mubr.msk.f32.mxu0 %vm262_vm1, %v136_v28  ;;  %1251 = vmatpush3.bf16.msra.mxu0 %v1436_v11 }
  0xdf   :  { %1253 = vmatprep.subr.bf16.mxu0 %v1452_v16 }
  0xe0   :  { %v138_v36 = vmax.f32 %v137_v33, 0.0  ;;  %v139_v37 = vadd.f32 %v1159_v29, %v137_v33  ;;  %v251_v38 = vadd.f32 %v1167_v30, %v249_v34  ;;  %v250_v41 = vmax.f32 %v249_v34, 0.0 }
  0xe1   :  { %1176 = vmatmul.mubr.msk.f32.gmra.mrb[6].mxu0 %vm262_vm1, %v248_v35 }
  0xe2   :  { %1178 = vmatprep.mubr.msk.f32.mxu0 %vm262_vm1, %v138_v36  ;;  %v1194_v40 = vpop.f32.mrb[4].mxu1  ;;  %1255 = vmatpush3.bf16.msra.mxu0 %v1452_v16  ;;  %v140_v43 = vmax.f32 %v139_v37, 0.0  ;;  %v252_v46 = vmax.f32 %v251_v38, 0.0 }
  0xe3   :  { %v473_v42 = vpop.f32.mrb[5].mxu1  ;;  %v479_v45 = vadd.f32 %v1194_v40, %v1478_v39 }
  0xe4   :  { %v474_v44 = vadd.f32 %v1478_v39, %v473_v42 }
  0xe5   :  { %1179 = vmatmul.mubr.msk.f32.gmra.mrb[8].mxu0 %vm262_vm1, %v250_v41 }
  0xe6   :  { %1181 = vmatprep.mubr.msk.f32.mxu0 %vm262_vm1, %v140_v43  ;;  %498 = vrot.lane.b32.xlu0 %v474_v44, %s1348_s4 }
  0xe9   :  { %1182 = vmatmul.mubr.msk.f32.gmra.mrb[10].mxu0 %vm262_vm1, %v252_v46 }
  0xea   :  { %500 = vrot.lane.b32.xlu0 %v479_v45, %s1348_s4 }
 0x158   :  { %v499_v8 = vpop.permute.xlu0 %498 }
 0x15c   :  { %v501_v13 = vpop.permute.xlu0 %500 }
 0x1b0   :  { %v1174_v48 = vpop.f32.mrb[4].mxu0 }
 0x1b1   :  { %v359_v49 = vadd.f32 %v1174_v48, %v1082_v47  ;;  %v353_v50 = vpop.f32.mrb[5].mxu0 }
 0x1b2   :  { %v354_v51 = vadd.f32 %v1082_v47, %v353_v50 }
 0x1b3   :  { %v483_v52 = vadd.f32 %v479_v45, %v359_v49 }
 0x1b4   :  { %v482_v53 = vadd.f32 %v474_v44, %v354_v51  ;;  %v1177_v54 = vpop.f32.mrb[6].mxu0 }
 0x1b5   :  { %v1093_v55 = vmul.f32 -1.442695, %v483_v52  ;;  %v1492_v56 = vadd.f32 %v1177_v54, %v1082_v47  ;;  %v363_v57 = vpop.f32.mrb[7].mxu0 }
 0x1b6   :  { %v1092_v58 = vmul.f32 -1.442695, %v482_v53  ;;  %v1494_v59 = vadd.f32 %v1082_v47, %v363_v57 }
 0x1b7   :  { %1271 = vpow2.f32 %v1093_v55 }
 0x1b8   :  { %1273 = vpow2.f32 %v1092_v58  ;;  %v1180_v60 = vpop.f32.mrb[8].mxu0 }
 0x1b9   :  { %v1496_v61 = vadd.f32 %v1180_v60, %v1082_v47  ;;  %v373_v62 = vpop.f32.mrb[9].mxu0 }
 0x1ba   :  { %v1498_v63 = vadd.f32 %v1082_v47, %v373_v62 }
 0x1bc   :  { %v1183_v0 = vpop.f32.mrb[10].mxu0 }
 0x1bd   :  { %v1500_v1 = vadd.f32 %v1183_v0, %v1082_v47  ;;  %v383_v2 = vpop.f32.mrb[11].mxu0 }
 0x1be   :  { %v1502_v3 = vadd.f32 %v1082_v47, %v383_v2 }
 0x1c1   :  { %v1272_v4 = vpop.eup %1271 }
 0x1c2   :  { %v1274_v5 = vpop.eup %1273  ;;  %v491_v6 = vadd.f32 1.0, %v1272_v4 }
 0x1c3   :  { %v490_v7 = vadd.f32 1.0, %v1274_v5 }
 0x1c5   :  { %1275 = vrcp.f32 %v490_v7 }
 0x1c6   :  { %1277 = vrcp.f32 %v491_v6 }
 0x1cf   :  { %v1276_v9 = vpop.eup %1275 }
 0x1d0   :  { %v504_v10 = vmul.f32 %v1276_v9, %v499_v8  ;;  %v1278_v12 = vpop.eup %1277 }
 0x1d1   :  { %v505_v14 = vmul.f32 %v1278_v12, %v501_v13 }
 0x1d2   :  { %508 = vrot.lane.b32.xlu1 %v504_v10, %s1348_s4 }
 0x1d6   :  { %510 = vrot.lane.b32.xlu1 %v505_v14, %s1348_s4 }
 0x244   :  { %v509_v15 = vpop.permute.xlu1 %508 }
 0x245   :  { %v514_v17 = vadd.f32 %v509_v15, %v354_v51 }
 0x247   :  { %1279 = vtanh.f32 %v514_v17 }
 0x248   :  { %v511_v18 = vpop.permute.xlu1 %510 }
 0x249   :  { %v515_v19 = vadd.f32 %v511_v18, %v359_v49 }
 0x24b   :  { %1281 = vtanh.f32 %v515_v19 }
 0x251   :  { %v1280_v20 = vpop.eup %1279 }
 0x252   :  { %v518_v21 = vsub.f32 0.0, %v1280_v20 }
 0x254   :  { %522 = vrot.lane.b32.xlu0 %v518_v21, %s1349_s3 }
 0x255   :  { %v1282_v22 = vpop.eup %1281 }
 0x256   :  { %v519_v23 = vsub.f32 0.0, %v1282_v22 }
 0x258   :  { %524 = vrot.lane.b32.xlu1 %v519_v23, %s1349_s3 }
 0x2c6   :  { %v523_v24 = vpop.permute.xlu0 %522 }
 0x2c7   :  { %v528_v25 = vmul.f32 %v1276_v9, %v523_v24 }
 0x2c9   :  { %532 = vrot.lane.b32.xlu0 %v528_v25, %s1350_s15 }
 0x2ca   :  { %v525_v26 = vpop.permute.xlu1 %524 }
 0x2cb   :  { %v529_v27 = vmul.f32 %v1278_v12, %v525_v26 }
 0x2cd   :  { %534 = vrot.lane.b32.xlu1 %v529_v27, %s1350_s15 }
 0x33b   :  { %v533_v28 = vpop.permute.xlu0 %532 }
 0x33c   :  { %v1510_v29 = vadd.f32 %v1280_v20, %v533_v28 }
 0x33e   :  { %544 = vrot.lane.b32.xlu0 %v1510_v29, %s1348_s4 }
 0x33f   :  { %v535_v30 = vpop.permute.xlu1 %534 }
 0x340   :  { %v1514_v31 = vadd.f32 %v1282_v22, %v535_v30 }
 0x342   :  { %546 = vrot.lane.b32.xlu1 %v1514_v31, %s1348_s4 }
 0x3b0   :  { %v545_v32 = vpop.permute.xlu0 %544 }
 0x3b1   :  { %1203 = vmatprep.mubr.msk.f32.mxu1 %vm403_vm2, %v545_v32 }
 0x3b4   :  { %v547_v33 = vpop.permute.xlu1 %546 }
 0x3b5   :  { %1204 = vmatmul.mubr.msk.f32.vlgmr.msra.gmra.mrb[6].mxu1 %vm403_vm2, %v547_v33 }
 0x3b6   :  { %1259 = vmatpush3.bf16.msra.mxu1 %v1436_v11 }
 0x3b7   :  { %1261 = vmatprep.subr.bf16.mxu1 %v1452_v16 }
 0x3ba   :  { %1263 = vmatpush3.bf16.msra.mxu1 %v1452_v16 }
 0x488   :  { %v1205_v34 = vpop.f32.mrb[6].mxu1 }
 0x489   :  { %v624_v35 = vadd.f32 %v1205_v34, %v1478_v39  ;;  %v618_v36 = vpop.f32.mrb[7].mxu1 }
 0x48a   :  { %v619_v37 = vadd.f32 %v1478_v39, %v618_v36 }
 0x48b   :  { %645 = vrot.lane.b32.xlu1 %v624_v35, %s1348_s4  ;;  %v628_v38 = vadd.f32 %v624_v35, %v1492_v56 }
 0x48c   :  { %643 = vrot.lane.b32.xlu0 %v619_v37, %s1348_s4  ;;  %v627_v40 = vadd.f32 %v619_v37, %v1494_v59 }
 0x48d   :  { %v1097_v41 = vmul.f32 -1.442695, %v628_v38 }
 0x48e   :  { %v1096_v11 = vmul.f32 -1.442695, %v627_v40 }
 0x48f   :  { %1283 = vpow2.f32 %v1097_v41 }
 0x490   :  { %1285 = vpow2.f32 %v1096_v11 }
 0x499   :  { %v1284_v42 = vpop.eup %1283 }
 0x49a   :  { %v1286_v16 = vpop.eup %1285  ;;  %v636_v43 = vadd.f32 1.0, %v1284_v42 }
 0x49b   :  { %v635_v44 = vadd.f32 1.0, %v1286_v16 }
 0x49c   :  { %1287 = vrcp.f32 %v636_v43 }
 0x49d   :  { %1289 = vrcp.f32 %v635_v44 }
 0x4a6   :  { %v1288_v45 = vpop.eup %1287 }
 0x4a7   :  { %v1290_v47 = vpop.eup %1289 }
 0x4fd   :  { %v646_v46 = vpop.permute.xlu1 %645 }
 0x4fe   :  { %v650_v48 = vmul.f32 %v1288_v45, %v646_v46  ;;  %v644_v49 = vpop.permute.xlu0 %643 }
 0x4ff   :  { %v649_v50 = vmul.f32 %v1290_v47, %v644_v49 }
 0x500   :  { %655 = vrot.lane.b32.xlu1 %v650_v48, %s1348_s4 }
 0x501   :  { %653 = vrot.lane.b32.xlu0 %v649_v50, %s1348_s4 }
 0x572   :  { %v656_v51 = vpop.permute.xlu1 %655 }
 0x573   :  { %v660_v52 = vadd.f32 %v656_v51, %v1492_v56  ;;  %v654_v53 = vpop.permute.xlu0 %653 }
 0x574   :  { %v659_v54 = vadd.f32 %v654_v53, %v1494_v59 }
 0x575   :  { %1291 = vtanh.f32 %v660_v52 }
 0x576   :  { %1293 = vtanh.f32 %v659_v54 }
 0x57f   :  { %v1292_v55 = vpop.eup %1291 }
 0x580   :  { %v1294_v57 = vpop.eup %1293  ;;  %v664_v58 = vsub.f32 %v1514_v31, %v1292_v55 }
 0x581   :  { %v663_v60 = vsub.f32 %v1510_v29, %v1294_v57 }
 0x582   :  { %669 = vrot.lane.b32.xlu1 %v664_v58, %s1349_s3 }
 0x583   :  { %667 = vrot.lane.b32.xlu0 %v663_v60, %s1349_s3 }
 0x5f4   :  { %v670_v62 = vpop.permute.xlu1 %669 }
 0x5f5   :  { %v674_v0 = vmul.f32 %v1288_v45, %v670_v62  ;;  %v668_v2 = vpop.permute.xlu0 %667 }
 0x5f6   :  { %v673_v4 = vmul.f32 %v1290_v47, %v668_v2 }
 0x5f7   :  { %679 = vrot.lane.b32.xlu1 %v674_v0, %s1350_s15 }
 0x5f8   :  { %677 = vrot.lane.b32.xlu0 %v673_v4, %s1350_s15 }
 0x669   :  { %v680_v56 = vpop.permute.xlu1 %679 }
 0x66a   :  { %v1539_v59 = vadd.f32 %v1292_v55, %v680_v56  ;;  %v678_v5 = vpop.permute.xlu0 %677 }
 0x66b   :  { %v1541_v6 = vadd.f32 %v1294_v57, %v678_v5 }
 0x66c   :  { %691 = vrot.lane.b32.xlu1 %v1539_v59, %s1348_s4 }
 0x66d   :  { %689 = vrot.lane.b32.xlu0 %v1541_v6, %s1348_s4 }
 0x6de   :  { %v692_v8 = vpop.permute.xlu1 %691 }
 0x6df   :  { %v690_v7 = vpop.permute.xlu0 %689 }
 0x6e0   :  { %1214 = vmatprep.mubr.msk.f32.mxu0 %vm403_vm2, %v690_v7 }
 0x6e1   :  { %1215 = vmatmul.mubr.msk.f32.vlgmr.msra.gmra.mrb[12].mxu0 %vm403_vm2, %v692_v8 }
 0x7b4   :  { %v1216_v9 = vpop.f32.mrb[12].mxu0 }
 0x7b5   :  { %v769_v10 = vadd.f32 %v1216_v9, %v1478_v39  ;;  %v763_v12 = vpop.f32.mrb[13].mxu0 }
 0x7b6   :  { %v764_v13 = vadd.f32 %v1478_v39, %v763_v12 }
 0x7b7   :  { %790 = vrot.lane.b32.xlu1 %v769_v10, %s1348_s4  ;;  %v773_v14 = vadd.f32 %v769_v10, %v1496_v61 }
 0x7b8   :  { %788 = vrot.lane.b32.xlu0 %v764_v13, %s1348_s4  ;;  %v772_v15 = vadd.f32 %v764_v13, %v1498_v63 }
 0x7b9   :  { %v1101_v17 = vmul.f32 -1.442695, %v773_v14 }
 0x7ba   :  { %v1100_v18 = vmul.f32 -1.442695, %v772_v15 }
 0x7bb   :  { %1295 = vpow2.f32 %v1101_v17 }
 0x7bc   :  { %1297 = vpow2.f32 %v1100_v18 }
 0x7c5   :  { %v1296_v19 = vpop.eup %1295 }
 0x7c6   :  { %v1298_v20 = vpop.eup %1297  ;;  %v781_v21 = vadd.f32 1.0, %v1296_v19 }
 0x7c7   :  { %v780_v22 = vadd.f32 1.0, %v1298_v20 }
 0x7c8   :  { %1299 = vrcp.f32 %v781_v21 }
 0x7c9   :  { %1301 = vrcp.f32 %v780_v22 }
 0x7d2   :  { %v1300_v23 = vpop.eup %1299 }
 0x7d3   :  { %v1302_v25 = vpop.eup %1301 }
 0x829   :  { %v791_v24 = vpop.permute.xlu1 %790 }
 0x82a   :  { %v795_v26 = vmul.f32 %v1300_v23, %v791_v24  ;;  %v789_v27 = vpop.permute.xlu0 %788 }
 0x82b   :  { %v794_v28 = vmul.f32 %v1302_v25, %v789_v27 }
 0x82c   :  { %800 = vrot.lane.b32.xlu1 %v795_v26, %s1348_s4 }
 0x82d   :  { %798 = vrot.lane.b32.xlu0 %v794_v28, %s1348_s4 }
 0x89e   :  { %v801_v30 = vpop.permute.xlu1 %800 }
 0x89f   :  { %v805_v32 = vadd.f32 %v801_v30, %v1496_v61  ;;  %v799_v33 = vpop.permute.xlu0 %798 }
 0x8a0   :  { %v804_v34 = vadd.f32 %v799_v33, %v1498_v63 }
 0x8a1   :  { %1303 = vtanh.f32 %v805_v32 }
 0x8a2   :  { %1305 = vtanh.f32 %v804_v34 }
 0x8ab   :  { %v1304_v35 = vpop.eup %1303 }
 0x8ac   :  { %v1306_v36 = vpop.eup %1305  ;;  %v809_v37 = vsub.f32 %v1539_v59, %v1304_v35 }
 0x8ad   :  { %v808_v38 = vsub.f32 %v1541_v6, %v1306_v36 }
 0x8ae   :  { %814 = vrot.lane.b32.xlu1 %v809_v37, %s1349_s3 }
 0x8af   :  { %812 = vrot.lane.b32.xlu0 %v808_v38, %s1349_s3 }
 0x920   :  { %v815_v40 = vpop.permute.xlu1 %814 }
 0x921   :  { %v819_v41 = vmul.f32 %v1300_v23, %v815_v40  ;;  %v813_v11 = vpop.permute.xlu0 %812 }
 0x922   :  { %v818_v42 = vmul.f32 %v1302_v25, %v813_v11  ;;  %v1107_v11 = vld [vmem:[%s1626_s7] ss:$0 sm:$0xff] }
 0x923   :  { %824 = vrot.lane.b32.xlu1 %v819_v41, %s1350_s15 }
 0x924   :  { %822 = vrot.lane.b32.xlu0 %v818_v42, %s1350_s15  ;;  %v1106_v42 = vld [vmem:[%s1625_s6] ss:$0 sm:$0xff]  ;;  %s1351_s6 = smov [#allocation2]  }
 0x925   :  { %s1058_s7 = sshll.u32 %s1351_s6, 4  ;;  %s1059_s7 = int_to_ptr.vmem [resolvable:$true] %s1058_s7 }
 0x926   :  { %s1323_s19 = scalar_lea.vmem %s1059_s7, 256  ;;  %p1328_p1 = scmp.lt.s32.totalorder %s1059_s7, %s1059_s7 }
 0x927   :  { %p1324_p0 = scmp.ne.s32.totalorder %s1059_s7, %s1323_s19  ;;  %p1329_p2 = scmp.lt.s32.totalorder %s1323_s19, %s1323_s19 }
 0x929   :  { %p1330_p3 = por %p1329_p2, %p1328_p1 }
 0x92b   :  { %p1331_p4 = pnand %p1330_p3, %p1324_p0 }
 0x995   :  { %v825_v61 = vpop.permute.xlu1 %824 }
 0x996   :  { %v829_v63 = vadd.f32 %v1304_v35, %v825_v61  ;;  %v823_v16 = vpop.permute.xlu0 %822 }
 0x997   :  { %v828_v43 = vadd.f32 %v1306_v36, %v823_v16 }
 0x998   :  { %836 = vrot.lane.b32.xlu1 %v829_v63, %s1348_s4 }
 0x999   :  { %834 = vrot.lane.b32.xlu0 %v828_v43, %s1348_s4 }
 0xa0a   :  { %v837_v45 = vpop.permute.xlu1 %836 }
 0xa0b   :  { %v835_v44 = vpop.permute.xlu0 %834 }
 0xa0c   :  { %1225 = vmatprep.mubr.msk.f32.mxu1 %vm403_vm2, %v835_v44 }
 0xa0d   :  { %1226 = vmatmul.mubr.msk.f32.vlgmr.msra.gmra.mrb[8].mxu1 %vm403_vm2, %v837_v45 }
 0xae0   :  { %v1227_v46 = vpop.f32.mrb[8].mxu1 }
 0xae1   :  { %v914_v47 = vadd.f32 %v1227_v46, %v1478_v39  ;;  %v908_v48 = vpop.f32.mrb[9].mxu1 }
 0xae2   :  { %v909_v49 = vadd.f32 %v1478_v39, %v908_v48 }
 0xae3   :  { %935 = vrot.lane.b32.xlu1 %v914_v47, %s1348_s4  ;;  %v918_v50 = vadd.f32 %v914_v47, %v1500_v1 }
 0xae4   :  { %933 = vrot.lane.b32.xlu0 %v909_v49, %s1348_s4  ;;  %v917_v51 = vadd.f32 %v909_v49, %v1502_v3 }
 0xae5   :  { %v1105_v52 = vmul.f32 -1.442695, %v918_v50 }
 0xae6   :  { %v1104_v53 = vmul.f32 -1.442695, %v917_v51 }
 0xae7   :  { %1307 = vpow2.f32 %v1105_v52 }
 0xae8   :  { %1309 = vpow2.f32 %v1104_v53 }
 0xaf1   :  { %v1308_v54 = vpop.eup %1307 }
 0xaf2   :  { %v1310_v55 = vpop.eup %1309  ;;  %v926_v57 = vadd.f32 1.0, %v1308_v54 }
 0xaf3   :  { %v925_v58 = vadd.f32 1.0, %v1310_v55 }
 0xaf4   :  { %1311 = vrcp.f32 %v926_v57 }
 0xaf5   :  { %1313 = vrcp.f32 %v925_v58 }
 0xafe   :  { %v1312_v60 = vpop.eup %1311 }
 0xaff   :  { %v1314_v62 = vpop.eup %1313 }
 0xb55   :  { %v936_v39 = vpop.permute.xlu1 %935 }
 0xb56   :  { %v940_v0 = vmul.f32 %v1312_v60, %v936_v39  ;;  %v934_v2 = vpop.permute.xlu0 %933 }
 0xb57   :  { %v939_v4 = vmul.f32 %v1314_v62, %v934_v2 }
 0xb58   :  { %945 = vrot.lane.b32.xlu1 %v940_v0, %s1348_s4 }
 0xb59   :  { %943 = vrot.lane.b32.xlu0 %v939_v4, %s1348_s4 }
 0xbca   :  { %v946_v56 = vpop.permute.xlu1 %945 }
 0xbcb   :  { %v950_v5 = vadd.f32 %v946_v56, %v1500_v1  ;;  %v944_v7 = vpop.permute.xlu0 %943  ;;  %v686_v1 = vadd.f32 %v1539_v59, %v1514_v31 }
 0xbcc   :  { %v949_v8 = vadd.f32 %v944_v7, %v1502_v3  ;;  %v685_v3 = vadd.f32 %v1541_v6, %v1510_v29 }
 0xbcd   :  { %1315 = vtanh.f32 %v950_v5  ;;  %v831_v20 = vadd.f32 %v829_v63, %v686_v1 }
 0xbce   :  { %1317 = vtanh.f32 %v949_v8  ;;  %v830_v23 = vadd.f32 %v828_v43, %v685_v3 }
 0xbd7   :  { %v1316_v9 = vpop.eup %1315 }
 0xbd8   :  { %v1318_v10 = vpop.eup %1317  ;;  %v954_v12 = vsub.f32 %v829_v63, %v1316_v9 }
 0xbd9   :  { %v953_v13 = vsub.f32 %v828_v43, %v1318_v10 }
 0xbda   :  { %959 = vrot.lane.b32.xlu1 %v954_v12, %s1349_s3 }
 0xbdb   :  { %957 = vrot.lane.b32.xlu0 %v953_v13, %s1349_s3 }
 0xc4c   :  { %v960_v14 = vpop.permute.xlu1 %959 }
 0xc4d   :  { %v964_v15 = vmul.f32 %v1312_v60, %v960_v14  ;;  %v958_v17 = vpop.permute.xlu0 %957 }
 0xc4e   :  { %v963_v18 = vmul.f32 %v1314_v62, %v958_v17 }
 0xc4f   :  { %969 = vrot.lane.b32.xlu1 %v964_v15, %s1350_s15 }
 0xc50   :  { %967 = vrot.lane.b32.xlu0 %v963_v18, %s1350_s15 }
 0xcc1   :  { %v970_v19 = vpop.permute.xlu1 %969 }
 0xcc2   :  { %v974_v21 = vadd.f32 %v1316_v9, %v970_v19  ;;  %v968_v22 = vpop.permute.xlu0 %967 }
 0xcc3   :  { %v973_v24 = vadd.f32 %v1318_v10, %v968_v22 }
 0xcc4   :  { %v976_v25 = vadd.f32 %v974_v21, %v831_v20 }
 0xcc5   :  { %v975_v26 = vadd.f32 %v973_v24, %v830_v23 }
 0xcc6   :  { %981 = vrot.lane.b32.xlu1 %v976_v25, %s1348_s4 }
 0xcc7   :  { %979 = vrot.lane.b32.xlu0 %v975_v26, %s1348_s4 }
 0xd38   :  { %v982_v27 = vpop.permute.xlu1 %981 }
 0xd39   :  { %v980_v28 = vpop.permute.xlu0 %979  ;;  %v988_v30 = vsel %vm403_vm2, %v982_v27, 0.0 }
 0xd3a   :  { %989 = vadd.xlane.f32.xlu1 %v988_v30  ;;  %v985_v31 = vsel %vm403_vm2, %v980_v28, 0.0 }
 0xd3b   :  { %986 = vadd.xlane.f32.xlu0 %v985_v31 }
 0xdc7   :  { %v990_v29 = vpop.xlane.xlu1 %989 }
 0xdc8   :  { %v993_v59 = vmul.f32 0.03125, %v990_v29  ;;  %v987_v6 = vpop.xlane.xlu0 %986 }
 0xdc9   :  { %v992_v32 = vmul.f32 0.03125, %v987_v6 }
 0xdca   :  { %v995_v33 = vsub.f32 %v976_v25, %v993_v59 }
 0xdcb   :  { %v994_v34 = vsub.f32 %v975_v26, %v992_v32 }
 0xdcc   :  { %v997_v35 = vmul.f32 %v995_v33, %v995_v33 }
 0xdcd   :  { %v996_v36 = vmul.f32 %v994_v34, %v994_v34 }
 0xdce   :  { %1002 = vrot.lane.b32.xlu1 %v997_v35, %s1348_s4 }
 0xdcf   :  { %1000 = vrot.lane.b32.xlu0 %v996_v36, %s1348_s4 }
 0xe40   :  { %v1003_v37 = vpop.permute.xlu1 %1002 }
 0xe41   :  { %v1001_v38 = vpop.permute.xlu0 %1000  ;;  %v1009_v40 = vsel %vm403_vm2, %v1003_v37, 0.0 }
 0xe42   :  { %1010 = vadd.xlane.f32.xlu1 %v1009_v40  ;;  %v1006_v41 = vsel %vm403_vm2, %v1001_v38, 0.0 }
 0xe43   :  { %1007 = vadd.xlane.f32.xlu0 %v1006_v41 }
 0xe53   :  { %1037 = vrot.lane.b32.xlu1 %v1107_v11, %s1348_s4 }
 0xe59   :  { %1026 = vrot.lane.b32.xlu0 %v1106_v42, %s1348_s4 }
 0xecf   :  { %v1011_v61 = vpop.xlane.xlu1 %1010 }
 0xed0   :  { %v1013_v63 = vmul.f32 0.03125, %v1011_v61  ;;  %v1008_v16 = vpop.xlane.xlu0 %1007 }
 0xed1   :  { %v1012_v43 = vmul.f32 0.03125, %v1008_v16 }
 0xed2   :  { %v1015_v44 = vadd.f32 1e-05, %v1013_v63 }
 0xed3   :  { %v1014_v45 = vadd.f32 1e-05, %v1012_v43  ;;  %v1038_v51 = vpop.permute.xlu1 %1037 }
 0xed4   :  { %1319 = vrsqrt.f32 %v1015_v44  ;;  %v1027_v47 = vpop.permute.xlu0 %1026 }
 0xed5   :  { %1321 = vrsqrt.f32 %v1014_v45 }
 0xede   :  { %v1320_v46 = vpop.eup %1319 }
 0xedf   :  { %v1322_v48 = vpop.eup %1321  ;;  %v1019_v49 = vmul.f32 %v1320_v46, %v995_v33 }
 0xee0   :  { %v1018_v50 = vmul.f32 %v1322_v48, %v994_v34 }
 0xee1   :  { %v1030_v52 = vmul.f32 %v1027_v47, %v1019_v49 }
 0xee2   :  { %v1029_v53 = vmul.f32 %v1027_v47, %v1018_v50 }
 0xee3   :  { %v1041_v54 = vadd.f32 %v1038_v51, %v1030_v52 }
 0xee4   :  { %v1040_v55 = vadd.f32 %v1038_v51, %v1029_v53 }
 0xee5   :  { %1048 = vrot.lane.b32.xlu1 %v1041_v54, %s1348_s4 }
 0xee6   :  { %1043 = vrot.lane.b32.xlu0 %v1040_v55, %s1348_s4 }
 0xf57   :  { %v1049_v57 = vpop.permute.xlu1 %1048 }
 0xf58   :  { %1052 = vst.msk [vmem:[#allocation2 + $0x8] sm:$0xff] %vm403_vm2, %v1049_v57  ;;  %v1044_v58 = vpop.permute.xlu0 %1043 }
 0xf59   :  { %1046 = vst.msk [vmem:[#allocation2] sm:$0xff] %vm403_vm2, %v1044_v58 }
 0xf5a   :  { %1334 = shalt.err (!%p1331_p4)
}
 0xf5b   :  { %s1335_s22 = scalar_lea.hbm %s1627_s8, 256 }
 0xf5c   :  { %p1336_p5 = scmp.ne.s32.totalorder %s1627_s8, %s1335_s22  ;;  %p1339_p6 = scmp.lt.u32.totalorder %s1335_s22, %s1627_s8 }
 0xf5e   :  { %p1341_p7 = pnand %p1339_p6, %p1336_p5 }
 0xf60   :  { %1344 = shalt.err (!%p1341_p7)
}
 0xf61   :  { %s1352_s27 = smov 128   ;;  %s1353_s28 = smov 8  }
 0xf62   :  { %1064 = dma.vmem_to_hbm [thread:$0]  %s1059_s7, 256, %s1627_s8, [#allocation3], %s1352_s27, %s1352_s27, %s1353_s28  }
 0xf63   :  { %1345 = dma.done.wait [#allocation3], 256  }
 0xf64   :  { %1346 = vsyncadd [#allocation3], 4294967040 }
 0xf65   :  { %1068 = vsyncpa [#allocation3], 1 }

</bundles_post_ra>
